<compile_context>
chip_gen: v5e
topology: v5e:2x2
jax: 0.10.0
libtpu: 0.0.40
codegen_flags: <defaults>
</compile_context>

<pallas_src>
import jax
import jax.numpy as jnp
from jax.experimental import pallas as pl
from jax.experimental.pallas import tpu as pltpu

_LANE = 128
_SUB = 8
# ~2 MiB per pipeline buffer: 2 arrays x 2 buffers => ~8 MiB pipelined VMEM,
# comfortably inside the scoped-VMEM defaults on v5e / v6e / v7x.
_TARGET_TILE_BYTES = 2 * 1024 * 1024


def _make_lsq_kernel(thd_neg, thd_pos):
    thd_neg_f = float(thd_neg)
    thd_pos_f = float(thd_pos)

    def lsq_kernel(s_ref, x_ref, o_ref):
        s = s_ref[0].astype(jnp.float32)          # scalar scale from SMEM
        inv_s = 1.0 / s                           # one scalar reciprocal
        # Compute in f32 in-register; HBM traffic stays in the input dtype.
        y = x_ref[...].astype(jnp.float32) * inv_s
        y = jnp.clip(y, thd_neg_f, thd_pos_f)     # clamp to quant range
        y = jnp.round(y)                          # half-to-even, matches torch
        o_ref[...] = (y * s).astype(o_ref.dtype)  # dequantize, store in HBM dtype

    return lsq_kernel


def lsq_quan_forward(x, s, *, bit=8, symmetric=True):
    """Pallas implementation of LsqQuan.forward.

    x: arbitrary-shaped float array (e.g. NCHW activations), any float dtype.
    s: shape-(1,) scale parameter (nn.Parameter(th.ones(1))).
    """
    if symmetric:
        thd_neg = -(2 ** (bit - 1)) + 1
    else:
        thd_neg = -(2 ** (bit - 1))
    thd_pos = 2 ** (bit - 1) - 1

    orig_shape = x.shape
    orig_dtype = x.dtype
    n = x.size

    # Flatten to a lane-dense (rows, 128) slab; only pad if the size is not
    # already a multiple of 8*128 (avoids an extra HBM pass on aligned inputs).
    align = _LANE * _SUB
    flat = x.reshape(-1)
    pad = (-n) % align
    if pad:
        flat = jnp.pad(flat, (0, pad))
    x2 = flat.reshape(-1, _LANE)
    rows = x2.shape[0]

    # Tile sizing: biggest tile up to ~2 MiB per buffer, multiple of 8 rows,
    # but keep at least 2 grid steps when possible so both v7x TensorCores
    # stream (dimension_semantics=("parallel",)).
    itemsize = jnp.dtype(orig_dtype).itemsize
    max_tile_rows = max(_SUB, (_TARGET_TILE_BYTES // (_LANE * itemsize)) // _SUB * _SUB)
    if rows > _SUB:
        half_rows = -(-((rows + 1) // 2) // _SUB) * _SUB   # ceil(rows/2) rounded up to 8
        tile_rows = min(max_tile_rows, half_rows)
    else:
        tile_rows = rows
    grid = (pl.cdiv(rows, tile_rows),)   # ragged last block is masked by the pipeline

    kernel = _make_lsq_kernel(thd_neg, thd_pos)

    out2 = pl.pallas_call(
        kernel,
        out_shape=jax.ShapeDtypeStruct((rows, _LANE), orig_dtype),
        grid=grid,
        in_specs=[
            pl.BlockSpec(memory_space=pltpu.SMEM),                  # s (scalar)
            pl.BlockSpec((tile_rows, _LANE), lambda i: (i, 0)),     # x tile
        ],
        out_specs=pl.BlockSpec((tile_rows, _LANE), lambda i: (i, 0)),
        # Output reuses the input slab's HBM allocation when donated under jit.
        input_output_aliases={1: 0},
        compiler_params=pltpu.CompilerParams(
            dimension_semantics=("parallel",),
        ),
        # TODO(synk): on v7x, sweep pipeline_mode=pl.Buffered(3) on the x tile
        # once tiles are large; expected only a few-% win.
    )(s, x2)

    if pad:
        out = out2.reshape(-1)[:n].reshape(orig_shape)
    else:
        out = out2.reshape(orig_shape)
    return out


def lsq_quan_reference(x, s, *, bit=8, symmetric=True):
    """Pure-JAX reference for correctness checking."""
    if symmetric:
        thd_neg = -(2 ** (bit - 1)) + 1
    else:
        thd_neg = -(2 ** (bit - 1))
    thd_pos = 2 ** (bit - 1) - 1
    sv = s[0].astype(jnp.float32)
    y = jnp.clip(x.astype(jnp.float32) / sv, thd_neg, thd_pos)
    y = jnp.round(y)
    return (y * sv).astype(x.dtype)


if __name__ == "__main__":
    key = jax.random.PRNGKey(0)
    # NCHW activation, small shape (consistent with the agent's conv activations).
    x = jax.random.normal(key, (2, 4, 16, 16), dtype=jnp.float32) * 3.0
    # Parameter init matches nn.Parameter(th.ones(1)).
    s = jnp.ones((1,), dtype=jnp.float32)

    out = lsq_quan_forward(x, s, bit=8, symmetric=True)
    out = jax.block_until_ready(out)

    ref = lsq_quan_reference(x, s, bit=8, symmetric=True)
    assert out.shape == x.shape and out.dtype == x.dtype
    assert jnp.allclose(out, ref, atol=1e-6, rtol=1e-6), "mismatch vs reference"

    print("KERNEL_OK")
</pallas_src>

<mosaic_0001>
module attributes {stable_mosaic.version = 11 : i64} {
  func.func @lsq_kernel(%arg0: i32, %arg1: memref<1xf32, #tpu.memory_space<smem>>, %arg2: memref<8x128xf32, #tpu.memory_space<vmem>>, %arg3: memref<8x128xf32, #tpu.memory_space<vmem>>) attributes {dimension_semantics = [#tpu.dimension_semantics<parallel>], iteration_bounds = array<i64: 2>, scalar_prefetch = 0 : i64, scratch_operands = 0 : i64, tpu.core_type = #tpu.core_type<tc>, window_params = [{transform_indices = @transform_0, window_bounds = array<i64: 1>}, {transform_indices = @transform_1, window_bounds = array<i64: 8, 128>}, {transform_indices = @transform_2, window_bounds = array<i64: 8, 128>}]} {
    %c0 = arith.constant 0 : index
    %0 = memref.load %arg1[%c0] : memref<1xf32, #tpu.memory_space<smem>>
    %cst = arith.constant 1.000000e+00 : f32
    %1 = arith.divf %cst, %0 : f32
    %c0_0 = arith.constant 0 : index
    %c0_1 = arith.constant 0 : index
    %2 = vector.load %arg2[%c0_0, %c0_1] : memref<8x128xf32, #tpu.memory_space<vmem>>, vector<8x128xf32>
    %3 = vector.broadcast %1 : f32 to vector<8x128xf32>
    %4 = arith.mulf %2, %3 : vector<8x128xf32>
    %cst_2 = arith.constant -1.270000e+02 : f32
    %cst_3 = arith.constant 1.270000e+02 : f32
    %5 = vector.broadcast %cst_2 : f32 to vector<8x128xf32>
    %6 = arith.maximumf %5, %4 : vector<8x128xf32>
    %7 = vector.broadcast %cst_3 : f32 to vector<8x128xf32>
    %8 = arith.minimumf %7, %6 : vector<8x128xf32>
    %9 = math.roundeven %8 : vector<8x128xf32>
    %10 = vector.broadcast %0 : f32 to vector<8x128xf32>
    %11 = arith.mulf %9, %10 : vector<8x128xf32>
    %c0_4 = arith.constant 0 : index
    %c0_5 = arith.constant 0 : index
    %12 = vector.load %arg3[%c0_4, %c0_5] : memref<8x128xf32, #tpu.memory_space<vmem>>, vector<8x128xf32>
    tpu.vector_store %arg3[%c0_4, %c0_5], %11 {strides = array<i32>} : memref<8x128xf32, #tpu.memory_space<vmem>>, vector<8x128xf32>,
    return
  }
  func.func @transform_0(%arg0: i32) -> i32 {
    %c0_i32 = arith.constant 0 : i32
    %c0_i32_0 = arith.constant 0 : i32
    return %c0_i32 : i32
  }
  func.func @transform_1(%arg0: i32) -> (i32, i32) {
    %c0_i32 = arith.constant 0 : i32
    %c0_i32_0 = arith.constant 0 : i32
    return %arg0, %c0_i32 : i32, i32
  }
  func.func @transform_2(%arg0: i32) -> (i32, i32) {
    %c0_i32 = arith.constant 0 : i32
    %c0_i32_0 = arith.constant 0 : i32
    return %arg0, %c0_i32 : i32, i32
  }
}

</mosaic_0001>

<bundles_post_ra>
// kernel: tpu_custom_call.1
= control target key start
LH: loop header
LB: loop body
LE: loop exit
PB: predicated region body
PF: predicated region fallthrough
CT: control target
= control target key end

     0   :  { %s592_s0 = inlined_call_operand.<no memory space> [shape: f32[1], index: 0, kind: input, shape index: {}]   ;;  %s593_s1 = inlined_call_operand.hbm [shape: f32[16,128], index: 1, kind: input, shape index: {}, may-alias: {1,2}]   ;;  %s594_s2 = inlined_call_operand.hbm [shape: f32[16,128], index: 2, kind: output, shape index: {}, may-alias: {1,2}]  }
   0x1   :  { %7 = sst [smem:[#allocation2]] %s592_s0 }
   0x2   :  { %8 = vsyncpa [#allocation4], 0 }
   0x3   :  { %10 = vsyncpa [#allocation4 + $0x1], 0 }
   0x4   :  { %11 = vsyncpa [#allocation5], 0 }
   0x5   :  { %13 = vsyncpa [#allocation5 + $0x1], 0  ;;  %s461_s11 = smov 0   ;;  %s463_s12 = smov 0  }
   0x6   :  { %s465_s13 = smov 0   ;;  %s467_s14 = smov 0  }
   0x7 LB: > { %s482_s0 = sadd.s32 4294967295, %s441_s14   ;;  %s274_s15 = sadd.s32 4294967294, %s441_s14   ;;  %s441_s14 = sphi %s467_s14, %s604_s14   ;;  %s437_s13 = sphi %s465_s13, %s603_s13   ;;  %s433_s12 = sphi %s463_s12, %s602_s12   ;;  %s429_s11 = sphi %s461_s11, %s601_s11  }
   0x8   : > { %s486_s16 = sadd.s32 1, %s441_s14   ;;  %s47_s17 = sadd.s32 1, %s437_s13 }
   0x9   : > { %s44_s18 = ssub.s32 %s441_s14, %s486_s16  ;;  %p54_p0 = scmp.ne.s32.totalorder %s437_s13, %s433_s12 }
   0xa   : > { %p45_p1 = scmp.eq.s32.totalorder %s44_s18, 0  ;;  %p55_p2 = scmp.eq.s32.totalorder %s441_s14, 0 }
   0xb   : > { %p60_p3 = scmp.ne.s32.totalorder %s433_s12, %s429_s11  ;;  %p61_p4 = scmp.eq.s32.totalorder %s482_s0, 0 }
   0xc   : > { %s498_s19 = scalar_select %p45_p1, %s437_s13, %s47_s17  }
   0xd   : > { %p500_p5 = por %p55_p2, %p54_p0  ;;  %p504_p6 = por %p61_p4, %p60_p3 }
   0xe   : > { %p84_p7 = scmp.eq.s32.totalorder %s482_s0, 1  ;;  %p90_p8 = scmp.eq.s32.totalorder %s274_s15, 1 }
   0xf   : > { %p309_p10 = scmp.lt.s32.totalorder %s441_s14, 2  ;;  %s113_s24 = sand.u32 1, %s437_s13  }
  0x10   : > { %p511_p11 = por %p84_p7, %p54_p0  ;;  %p515_p12 = por %p90_p8, %p60_p3 }
  0x11   : > { %s278_s25 = sshll.u32 %s441_s14, 3  ;;  %s277_s26 = sshll.u32 %s113_s24, 3 }
  0x12   : > { %s121_s29 = scalar_lea.hbm %s593_s1, %s278_s25  ;;  %s117_s3 = scalar_lea.vmem [#allocation3], %s277_s26 }
  0x13   : > { %s123_s30 = sshll.u32 %s121_s29, 4  ;;  %s125_s4 = sshll.u32 %s117_s3, 4  ;;  %s124_s30 = int_to_ptr.hbm [resolvable:$true] %s123_s30  ;;  %s126_s4 = int_to_ptr.vmem [resolvable:$true] %s125_s4 }
  0x14   : > { %p526_p13 = pnand %p309_p10, %p500_p5  ;;  %p279_p0 = scmp.ge.s32.totalorder %s441_s14, 1 }
  0x15   : > { %p130_p1 = scmp.lt.s32.totalorder %s441_s14, 3  ;;  %s114_s6 = scalar_lea.sflag [#allocation4], %s113_s24 }
  0x16   : > { %s345_s7 = sshra.s32 %s124_s30, 4  ;;  %p349_p3 = pneg %p526_p13  ;;  %s346_s7 = int_to_ptr.hbm [resolvable:$true] %s345_s7 }
  0x17   : > { %s347_s8 = scalar_lea.hbm %s346_s7, 8  ;;  %s352_s15 = scalar_lea.hbm %s593_s1, 16 }
  0x18   : > { %p348_p2 = scmp.ne.s32.totalorder %s346_s7, %s347_s8  ;;  %p353_p5 = scmp.lt.s32.totalorder %s346_s7, %s593_s1 }
  0x19   : > { %p354_p8 = scmp.lt.s32.totalorder %s352_s15, %s347_s8 }
  0x1a   : > { %p350_p4 = pnand %p349_p3, %p348_p2 }
  0x1b   : > { %p355_p10 = por %p354_p8, %p353_p5 }
  0x1c   : > { %p351_p7 = pneg %p350_p4 }
  0x1e   : > { %p356_p9 = pnand %p355_p10, %p351_p7 }
  0x20   : > { %359 = shalt.err (!%p356_p9)
}
  0x21   : > { %304 = dma.hbm_to_vmem [thread:$0]  (!%p526_p13), %s124_s30, 128, %s126_s4, %s114_s6  }
  0x22   : > { %p131_p2 = pnand %p279_p0, %p130_p1 }
  0x23   : > { %s547_s20 = sand.u32 (!%p131_p2), 1, %s433_s12  }
  0x24   : > { %134 = sbr.rel (%p131_p2) target bundleno = 135 (0x87), region = 28  ;;  %s280_s24 = sshll.u32 (!%p131_p2), %s547_s20, 3 }
  0x25   : > { %s137_s25 = scalar_lea.sflag (!%p131_p2), [#allocation4], %s547_s20  ;;  %s140_s26 = scalar_lea.vmem (!%p131_p2), [#allocation3], %s280_s24 }
  0x29   : > { %420 = dma.done.wait (%p504_p6), %s137_s25, 128  }
  0x2a   : > { %422 = vsyncadd (%p504_p6), %s137_s25, 4294967168  ;;  %s162_s27 = sld [smem:[#allocation2]]  ;;  %v179_v11 = vld [vmem:[%s140_s26] sm:$0xff]  ;;  %s284_s28 = sshll.u32 %s482_s0, 3 }
  0x2b   : > { %s199_s3 = scalar_lea.hbm %s594_s2, %s284_s28  ;;  %s161_s4 = scalar_lea.vmem [#allocation6], %s280_s24 }
  0x2c   : > { %s201_s5 = sshll.u32 %s161_s4, 4  ;;  %s203_s6 = sshll.u32 %s199_s3, 4  ;;  %s202_s5 = int_to_ptr.vmem [resolvable:$true] %s201_s5  ;;  %s204_s6 = int_to_ptr.hbm [resolvable:$true] %s203_s6 }
  0x2d   : > { %s189_s0 = scalar_lea.sflag [#allocation5], %s547_s20  ;;  %s389_s7 = sshra.s32 %s204_s6, 4  ;;  %s390_s7 = int_to_ptr.hbm [resolvable:$true] %s389_s7 }
  0x2e   : > { %s391_s8 = scalar_lea.hbm %s390_s7, 8  ;;  %s395_s15 = scalar_lea.hbm %s594_s2, 16 }
  0x2f   : > { %p392_p6 = scmp.ne.s32.totalorder %s390_s7, %s391_s8  ;;  %p396_p0 = scmp.lt.s32.totalorder %s390_s7, %s594_s2 }
  0x30   : > { %v163_v0 = vstv %s162_s27  ;;  %p397_p1 = scmp.lt.s32.totalorder %s395_s15, %s391_s8 }
  0x31   : > { %343 = vrcp.f32 %v163_v0  ;;  %v175_v3 = vand.u32 2147483648, %v163_v0  ;;  %vm169_vm0 = vweird.f32 %v163_v0  ;;  %v173_v5 = vand.u32 2147483647, %v163_v0  ;;  %p393_p9 = pnand %p392_p6, %p511_p11 }
  0x32   : > { %p398_p3 = por %p397_p1, %p396_p0 }
  0x33   : > { %v176_v7 = vor.u32 1.1754944e-38, %v175_v3  ;;  %vm174_vm3 = vcmp.eq.f32.partialorder %v173_v5, 8.507059e+37  ;;  %p394_p13 = pneg %p393_p9 }
  0x35   : > { %p399_p4 = pnand %p398_p3, %p394_p13 }
  0x37   : > { %v344_v1 = vpop.eup %343 }
  0x38   : > { %v165_v2 = vmul.f32 %v344_v1, %v163_v0  ;;  %vm170_vm1 = vweird.f32 %v344_v1 }
  0x39   : > { %vm171_vm2 = vmor %vm169_vm0, %vm170_vm1 }
  0x3a   : > { %v166_v4 = vsub.f32 1.0, %v165_v2 }
  0x3c   : > { %v167_v6 = vmul.f32 %v344_v1, %v166_v4 }
  0x3e   : > { %v168_v8 = vadd.f32 %v344_v1, %v167_v6 }
  0x40   : > { %v172_v9 = vsel %vm171_vm2, %v344_v1, %v168_v8 }
  0x41   : > { %v177_v10 = vsel %vm174_vm3, %v176_v7, %v172_v9 }
  0x42   : > { %287 = vpush %v177_v10 }
  0x73   : > { %s288_s21 = spop %287 }
  0x74   : > { %v180_v12 = vstv %s288_s21 }
  0x75   : > { %v181_v13 = vmul.f32 %v180_v12, %v179_v11 }
  0x77   : > { %v282_v14 = vclamps-f32 %v181_v13, 127.0 }
  0x79   : > { %v291_v15 = vcvt.f32.s32 %v282_v14  ;;  %v289_v17 = vand.u32 2147483647, %v282_v14  ;;  %v294_v19 = vand.u32 2147483648, %v282_v14 }
  0x7b   : > { %v292_v16 = vcvt.s32.f32 %v291_v15  ;;  %vm290_vm4 = vcmp.lt.f32.partialorder %v289_v17, 8388608.0 }
  0x7d   : > { %v293_v18 = vand.u32 2147483647, %v292_v16 }
  0x7f   : > { %v295_v20 = vor.u32 %v294_v19, %v293_v18 }
  0x81   : > { %v296_v21 = vsel %vm290_vm4, %v295_v20, %v282_v14 }
  0x82   : > { %v186_v22 = vmul.f32 %v296_v21, %v163_v0 }
  0x84   : > { %187 = vst [vmem:[%s161_s4] sm:$0xff] %v186_v22 }
  0x85   : > { %402 = shalt.err (!%p399_p4)
}
  0x86   : > { %299 = dma.vmem_to_hbm [thread:$0]  (%p511_p11), %s202_s5, 128, %s204_s6, %s189_s0  }
  0x87 PF: > { %s215_s20 = sand.u32 1, %s429_s11   ;;  %p600_p7 = scmp.ge.s32.totalorder %s441_s14, 2 }
  0x88   : > { %s216_s24 = scalar_lea.sflag [#allocation5], %s215_s20 }
  0x89   : > { %p306_p5 = pnand %p600_p7, %p515_p12 }
  0x8b   : > { %p307_p8 = pneg %p306_p5 }
  0x8d   : > { %424 = dma.done.wait (%p307_p8), %s216_s24, 128  }
  0x8e   : > { %426 = vsyncadd (%p307_p8), %s216_s24, 4294967168  ;;  %p16_p10 = scmp.ge.s32.totalorder %s486_s16, 4   ;;  %s601_s11 = smov %s433_s12 }
  0x8f   : > { %s602_s12 = smov %s437_s13  ;;  %s603_s13 = smov %s498_s19 }
  0x90   : > { %s604_s14 = smov %s486_s16  ;;  %18 = sbr.rel (!%p16_p10) target bundleno = 7 (0x7), region = 73 }
  0x95   :  { %222 = vsyncpa [#allocation4], 1 }
  0x96   :  { %224 = vsyncpa [#allocation4 + $0x1], 1 }
  0x97   :  { %225 = vsyncpa [#allocation5], 1 }
  0x98   :  { %227 = vsyncpa [#allocation5 + $0x1], 1 }

</bundles_post_ra>
